<compile_context>
chip_gen: v6e
topology: v6e:2x2x1
jax: 0.10.0
libtpu: 0.0.40
codegen_flags: <defaults>
</compile_context>

<pallas_src>
import functools

import jax
import jax.numpy as jnp
from jax.experimental import pallas as pl
from jax.experimental.pallas import tpu as pltpu


def _round_up(a: int, b: int) -> int:
    return (a + b - 1) // b * b


def _vmem_budgets():
    """Returns (per-step sizing budget, scoped-VMEM limit) in bytes.

    v7x has 64 MiB VMEM per TensorCore (and both cores run tiles concurrently
    under a "parallel" grid axis), so stay conservative there and on unknown
    targets; v5e/v6e have 128 MiB, where bigger tiles amortize the ~0.35 us
    per-grid-step overhead and keep the HBM DMAs long.
    """
    try:
        kind = jax.devices()[0].device_kind.lower()
    except Exception:  # defensive: fall back to the conservative setting
        kind = ""
    if "v5" in kind or "v6" in kind:
        return 40 * 1024 * 1024, 64 * 1024 * 1024
    return 20 * 1024 * 1024, 28 * 1024 * 1024


@functools.partial(jax.jit, static_argnames=("tile_h",))
def corr2d_bias_pallas(x, weight, bias, *, tile_h=None):
    """Valid 2D cross-correlation of x with weight, plus scalar bias.

    x: (H, W) f32, weight: (kh, kw) f32, bias: (1,) f32 -> (H-kh+1, W-kw+1) f32
    """
    H, W = x.shape
    kh, kw = weight.shape
    Ho, Wo = H - kh + 1, W - kw + 1
    assert Ho >= 1 and Wo >= 1, "kernel larger than input"
    # The row halo of a tile is served by a single trailing (8, Wp) block.
    assert kh - 1 <= 8, "row halo > 8 rows not supported"
    # TODO(synk): support kh > 9 by fetching a multi-block halo.

    # ---- lane-dense geometry (columns only; rows are never padded) ---------
    Wp = _round_up(max(W, 128), 128)
    # Safety of the lane-roll trick below: wrapped lanes land in columns
    # >= Wp - (kw - 1) >= W - (kw - 1) = Wo, which are trimmed.  Keep Wp >= W.
    assert Wp >= Wo + kw - 1

    x_in = x.astype(jnp.float32)
    if Wp != W:                    # skip the pad entirely when W % 128 == 0
        x_in = jnp.pad(x_in, ((0, 0), (0, Wp - W)))

    sizing_budget, vmem_limit = _vmem_budgets()
    if tile_h is None:
        # ~5 double-buffered pipeline buffers + (kh + 2) in-kernel temporaries
        # (loaded tile, per-tap shifted copies, f32 accumulator), all tile-sized.
        per_row = (5 + kh + 2) * 4 * Wp
        max_rows = max(8, (sizing_budget // per_row) // 8 * 8)
        tile_h = int(min(_round_up(Ho, 8), max_rows, 512))
        if Ho > 256:
            # Keep >= 2 row tiles so a v7x megacore can feed both TensorCores.
            tile_h = min(tile_h, _round_up(pl.cdiv(Ho, 2), 8))
    tile_h = int(min(tile_h, _round_up(Ho, 8)))
    assert tile_h % 8 == 0 and tile_h >= 8

    nt = pl.cdiv(Ho, tile_h)          # number of row tiles (grid size)
    Ho_pad = _round_up(Ho, 8)         # sublane-aligned output rows (then trimmed)
    n_hblk = pl.cdiv(H, 8)            # number of 8-row blocks in the input

    w_flat = weight.reshape(-1).astype(jnp.float32)   # (kh*kw,) -> SMEM
    b_flat = bias.reshape(-1).astype(jnp.float32)     # (1,)     -> SMEM

    nb = tile_h if kh == 1 else tile_h - 8            # rows served by xm alone

    def kernel(w_ref, b_ref, xm_ref, xh_ref, o_ref):
        xm = xm_ref[...]                               # (tile_h, Wp), loaded once

        def accumulate(acc, rows, src):
            # `acc` already holds tap (0, 0) + bias; add the remaining taps.
            for i in range(kh):
                xi = src[i:i + rows, :]
                for j in range(kw):
                    if i == 0 and j == 0:
                        continue
                    # Column tap via XLU lane roll (co-issues with the VALU
                    # MACs). Wrapped lanes only touch trimmed columns >= Wo.
                    xs = xi if j == 0 else pltpu.roll(xi, shift=Wp - j, axis=1)
                    acc = acc + xs * w_ref[i * kw + j]
            return acc

        if nb > 0:
            # Output rows [0, nb): every tap lies inside the main tile.
            acc = xm[:nb, :] * w_ref[0] + b_ref[0]     # tap (0,0)+bias folded in
            o_ref[:nb, :] = accumulate(acc, nb, xm)
        if kh > 1:
            # The last 8 output rows also need the first (kh-1) halo rows:
            # stitch a small 16-row strip instead of concatenating the tile.
            strip = jnp.concatenate([xm[tile_h - 8:, :], xh_ref[...]], axis=0)
            acc = strip[:8, :] * w_ref[0] + b_ref[0]
            o_ref[tile_h - 8:, :] = accumulate(acc, 8, strip)

    grid_spec = pltpu.PrefetchScalarGridSpec(
        num_scalar_prefetch=2,                 # weight, bias live in SMEM
        grid=(nt,),
        in_specs=[
            # Main tile: tile_h image rows (last block may be partial; any
            # garbage rows only feed output rows >= Ho, which are trimmed).
            pl.BlockSpec((tile_h, Wp), lambda t, w, b: (t, 0)),
            # Halo: the 8-row block right below the tile, clamped into range.
            # The clamp only changes the index when (t+1)*tile_h >= H, i.e.
            # when no valid output row still needs the true halo.
            pl.BlockSpec(
                (8, Wp),
                lambda t, w, b: (
                    jnp.minimum((t + 1) * (tile_h // 8), n_hblk - 1), 0)),
        ],
        out_specs=pl.BlockSpec((tile_h, Wp), lambda t, w, b: (t, 0)),
    )

    out = pl.pallas_call(
        kernel,
        out_shape=jax.ShapeDtypeStruct((Ho_pad, Wp), jnp.float32),
        grid_spec=grid_spec,
        compiler_params=pltpu.CompilerParams(
            # Row tiles are independent -> both TensorCores on v7x; harmless
            # on single-TC v5e/v6e.
            dimension_semantics=("parallel",),
            vmem_limit_bytes=vmem_limit,
        ),
        cost_estimate=pl.CostEstimate(
            flops=2 * kh * kw * Ho * Wo,
            transcendentals=0,
            # Actual DMA traffic: main tiles + per-tile halo + output slab.
            bytes_accessed=4 * (H * Wp + nt * 8 * Wp + Ho_pad * Wp),
        ),
    )(w_flat, b_flat, x_in, x_in)

    # Trim the lane padding / alignment rows and the valid-convolution edges.
    return out[:Ho, :Wo]


class Conv2D:
    """JAX/Pallas port of the PyTorch Conv2D module (corr2d + bias)."""

    def __init__(self, kernel_size, key):
        w_key, b_key = jax.random.split(key)
        # Deterministic analogue of torch.randn initialization.
        self.weight = jax.random.normal(w_key, kernel_size, dtype=jnp.float32)
        self.bias = jax.random.normal(b_key, (1,), dtype=jnp.float32)

    def __call__(self, x, **kwargs):
        return corr2d_bias_pallas(x, self.weight, self.bias, **kwargs)


def _corr2d_ref(x, k, b):
    """Pure-JAX reference (same semantics as the torch corr2d + bias)."""
    H, W = x.shape
    kh, kw = k.shape
    Ho, Wo = H - kh + 1, W - kw + 1
    out = jnp.zeros((Ho, Wo), jnp.float32)
    for i in range(kh):
        for j in range(kw):
            out = out + x[i:i + Ho, j:j + Wo] * k[i, j]
    return out + b[0]


if __name__ == "__main__":
    key = jax.random.PRNGKey(0)
    x_key, x2_key, x3_key, param_key = jax.random.split(key, 4)

    conv = Conv2D(kernel_size=(3, 3), key=param_key)

    # Small 2D input, consistent with what the module's forward expects.
    H, W = 16, 16
    x = jax.random.normal(x_key, (H, W), dtype=jnp.float32)
    y = jax.block_until_ready(conv(x))
    y_ref = _corr2d_ref(x, conv.weight, conv.bias)
    assert y.shape == (H - 2, W - 2)
    assert jnp.allclose(y, y_ref, atol=1e-5, rtol=1e-5)

    # Multi-tile grid (tile_h=16 -> 3 row tiles): exercises the halo path, the
    # clamped halo index on the last tile and the parallel grid axis.
    H2, W2 = 48, 48
    x2 = jax.random.normal(x2_key, (H2, W2), dtype=jnp.float32)
    y2 = jax.block_until_ready(conv(x2, tile_h=16))
    y2_ref = _corr2d_ref(x2, conv.weight, conv.bias)
    assert y2.shape == (H2 - 2, W2 - 2)
    assert jnp.allclose(y2, y2_ref, atol=1e-5, rtol=1e-5)

    # Ragged case: H, W not multiples of 8 / 128 -> partial main and output
    # blocks plus a clamped halo; valid rows/cols must still match the ref.
    H3, W3 = 21, 40
    x3 = jax.random.normal(x3_key, (H3, W3), dtype=jnp.float32)
    y3 = jax.block_until_ready(conv(x3, tile_h=8))
    y3_ref = _corr2d_ref(x3, conv.weight, conv.bias)
    assert y3.shape == (H3 - 2, W3 - 2)
    assert jnp.allclose(y3, y3_ref, atol=1e-5, rtol=1e-5)

    print("KERNEL_OK")
</pallas_src>

<mosaic_0001>
module attributes {stable_mosaic.version = 11 : i64} {
  func.func @kernel(%arg0: i32, %arg1: memref<9xf32, #tpu.memory_space<smem>>, %arg2: memref<1xf32, #tpu.memory_space<smem>>, %arg3: memref<16x128xf32, #tpu.memory_space<vmem>>, %arg4: memref<8x128xf32, #tpu.memory_space<vmem>>, %arg5: memref<16x128xf32, #tpu.memory_space<vmem>>) attributes {dimension_semantics = [#tpu.dimension_semantics<parallel>], iteration_bounds = array<i64: 1>, scalar_prefetch = 2 : i64, scratch_operands = 0 : i64, tpu.core_type = #tpu.core_type<tc>, window_params = [{transform_indices = @transform_0, window_bounds = array<i64: 16, 128>}, {transform_indices = @transform_1, window_bounds = array<i64: 8, 128>}, {transform_indices = @transform_2, window_bounds = array<i64: 16, 128>}]} {
    %c0 = arith.constant 0 : index
    %c0_0 = arith.constant 0 : index
    %0 = vector.load %arg3[%c0, %c0_0] : memref<16x128xf32, #tpu.memory_space<vmem>>, vector<16x128xf32>
    %1 = vector.extract_strided_slice %0 {offsets = [0, 0], sizes = [8, 128], strides = [1, 1]} : vector<16x128xf32> to vector<8x128xf32>
    %c0_1 = arith.constant 0 : index
    %2 = memref.load %arg1[%c0_1] : memref<9xf32, #tpu.memory_space<smem>>
    %3 = vector.broadcast %2 : f32 to vector<8x128xf32>
    %4 = arith.mulf %1, %3 : vector<8x128xf32>
    %c0_2 = arith.constant 0 : index
    %5 = memref.load %arg2[%c0_2] : memref<1xf32, #tpu.memory_space<smem>>
    %6 = vector.broadcast %5 : f32 to vector<8x128xf32>
    %7 = arith.addf %4, %6 : vector<8x128xf32>
    %8 = vector.extract_strided_slice %0 {offsets = [0, 0], sizes = [8, 128], strides = [1, 1]} : vector<16x128xf32> to vector<8x128xf32>
    %c127_i32 = arith.constant 127 : i32
    %9 = tpu.dynamic_rotate %8 by %c127_i32 dim 1 : vector<8x128xf32>, i32 -> vector<8x128xf32>
    %c1 = arith.constant 1 : index
    %10 = memref.load %arg1[%c1] : memref<9xf32, #tpu.memory_space<smem>>
    %11 = vector.broadcast %10 : f32 to vector<8x128xf32>
    %12 = arith.mulf %9, %11 : vector<8x128xf32>
    %13 = arith.addf %7, %12 : vector<8x128xf32>
    %c126_i32 = arith.constant 126 : i32
    %14 = tpu.dynamic_rotate %8 by %c126_i32 dim 1 : vector<8x128xf32>, i32 -> vector<8x128xf32>
    %c2 = arith.constant 2 : index
    %15 = memref.load %arg1[%c2] : memref<9xf32, #tpu.memory_space<smem>>
    %16 = vector.broadcast %15 : f32 to vector<8x128xf32>
    %17 = arith.mulf %14, %16 : vector<8x128xf32>
    %18 = arith.addf %13, %17 : vector<8x128xf32>
    %19 = vector.extract_strided_slice %0 {offsets = [1, 0], sizes = [8, 128], strides = [1, 1]} : vector<16x128xf32> to vector<8x128xf32>
    %c3 = arith.constant 3 : index
    %20 = memref.load %arg1[%c3] : memref<9xf32, #tpu.memory_space<smem>>
    %21 = vector.broadcast %20 : f32 to vector<8x128xf32>
    %22 = arith.mulf %19, %21 : vector<8x128xf32>
    %23 = arith.addf %18, %22 : vector<8x128xf32>
    %c127_i32_3 = arith.constant 127 : i32
    %24 = tpu.dynamic_rotate %19 by %c127_i32_3 dim 1 : vector<8x128xf32>, i32 -> vector<8x128xf32>
    %c4 = arith.constant 4 : index
    %25 = memref.load %arg1[%c4] : memref<9xf32, #tpu.memory_space<smem>>
    %26 = vector.broadcast %25 : f32 to vector<8x128xf32>
    %27 = arith.mulf %24, %26 : vector<8x128xf32>
    %28 = arith.addf %23, %27 : vector<8x128xf32>
    %c126_i32_4 = arith.constant 126 : i32
    %29 = tpu.dynamic_rotate %19 by %c126_i32_4 dim 1 : vector<8x128xf32>, i32 -> vector<8x128xf32>
    %c5 = arith.constant 5 : index
    %30 = memref.load %arg1[%c5] : memref<9xf32, #tpu.memory_space<smem>>
    %31 = vector.broadcast %30 : f32 to vector<8x128xf32>
    %32 = arith.mulf %29, %31 : vector<8x128xf32>
    %33 = arith.addf %28, %32 : vector<8x128xf32>
    %34 = vector.extract_strided_slice %0 {offsets = [2, 0], sizes = [8, 128], strides = [1, 1]} : vector<16x128xf32> to vector<8x128xf32>
    %c6 = arith.constant 6 : index
    %35 = memref.load %arg1[%c6] : memref<9xf32, #tpu.memory_space<smem>>
    %36 = vector.broadcast %35 : f32 to vector<8x128xf32>
    %37 = arith.mulf %34, %36 : vector<8x128xf32>
    %38 = arith.addf %33, %37 : vector<8x128xf32>
    %c127_i32_5 = arith.constant 127 : i32
    %39 = tpu.dynamic_rotate %34 by %c127_i32_5 dim 1 : vector<8x128xf32>, i32 -> vector<8x128xf32>
    %c7 = arith.constant 7 : index
    %40 = memref.load %arg1[%c7] : memref<9xf32, #tpu.memory_space<smem>>
    %41 = vector.broadcast %40 : f32 to vector<8x128xf32>
    %42 = arith.mulf %39, %41 : vector<8x128xf32>
    %43 = arith.addf %38, %42 : vector<8x128xf32>
    %c126_i32_6 = arith.constant 126 : i32
    %44 = tpu.dynamic_rotate %34 by %c126_i32_6 dim 1 : vector<8x128xf32>, i32 -> vector<8x128xf32>
    %c8 = arith.constant 8 : index
    %45 = memref.load %arg1[%c8] : memref<9xf32, #tpu.memory_space<smem>>
    %46 = vector.broadcast %45 : f32 to vector<8x128xf32>
    %47 = arith.mulf %44, %46 : vector<8x128xf32>
    %48 = arith.addf %43, %47 : vector<8x128xf32>
    %c0_7 = arith.constant 0 : index
    %c0_8 = arith.constant 0 : index
    %49 = vector.load %arg5[%c0_7, %c0_8] : memref<16x128xf32, #tpu.memory_space<vmem>>, vector<8x128xf32>
    tpu.vector_store %arg5[%c0_7, %c0_8], %48 {strides = array<i32>} : memref<16x128xf32, #tpu.memory_space<vmem>>, vector<8x128xf32>,
    %50 = vector.extract_strided_slice %0 {offsets = [8, 0], sizes = [8, 128], strides = [1, 1]} : vector<16x128xf32> to vector<8x128xf32>
    %c0_9 = arith.constant 0 : index
    %c0_10 = arith.constant 0 : index
    %51 = vector.load %arg4[%c0_9, %c0_10] : memref<8x128xf32, #tpu.memory_space<vmem>>, vector<8x128xf32>
    %52 = tpu.concatenate %50, %51 in 0 : vector<8x128xf32>, vector<8x128xf32> -> vector<16x128xf32>
    %53 = vector.extract_strided_slice %52 {offsets = [0, 0], sizes = [8, 128], strides = [1, 1]} : vector<16x128xf32> to vector<8x128xf32>
    %c0_11 = arith.constant 0 : index
    %54 = memref.load %arg1[%c0_11] : memref<9xf32, #tpu.memory_space<smem>>
    %55 = vector.broadcast %54 : f32 to vector<8x128xf32>
    %56 = arith.mulf %53, %55 : vector<8x128xf32>
    %c0_12 = arith.constant 0 : index
    %57 = memref.load %arg2[%c0_12] : memref<1xf32, #tpu.memory_space<smem>>
    %58 = vector.broadcast %57 : f32 to vector<8x128xf32>
    %59 = arith.addf %56, %58 : vector<8x128xf32>
    %60 = vector.extract_strided_slice %52 {offsets = [0, 0], sizes = [8, 128], strides = [1, 1]} : vector<16x128xf32> to vector<8x128xf32>
    %c127_i32_13 = arith.constant 127 : i32
    %61 = tpu.dynamic_rotate %60 by %c127_i32_13 dim 1 : vector<8x128xf32>, i32 -> vector<8x128xf32>
    %c1_14 = arith.constant 1 : index
    %62 = memref.load %arg1[%c1_14] : memref<9xf32, #tpu.memory_space<smem>>
    %63 = vector.broadcast %62 : f32 to vector<8x128xf32>
    %64 = arith.mulf %61, %63 : vector<8x128xf32>
    %65 = arith.addf %59, %64 : vector<8x128xf32>
    %c126_i32_15 = arith.constant 126 : i32
    %66 = tpu.dynamic_rotate %60 by %c126_i32_15 dim 1 : vector<8x128xf32>, i32 -> vector<8x128xf32>
    %c2_16 = arith.constant 2 : index
    %67 = memref.load %arg1[%c2_16] : memref<9xf32, #tpu.memory_space<smem>>
    %68 = vector.broadcast %67 : f32 to vector<8x128xf32>
    %69 = arith.mulf %66, %68 : vector<8x128xf32>
    %70 = arith.addf %65, %69 : vector<8x128xf32>
    %71 = vector.extract_strided_slice %52 {offsets = [1, 0], sizes = [8, 128], strides = [1, 1]} : vector<16x128xf32> to vector<8x128xf32>
    %c3_17 = arith.constant 3 : index
    %72 = memref.load %arg1[%c3_17] : memref<9xf32, #tpu.memory_space<smem>>
    %73 = vector.broadcast %72 : f32 to vector<8x128xf32>
    %74 = arith.mulf %71, %73 : vector<8x128xf32>
    %75 = arith.addf %70, %74 : vector<8x128xf32>
    %c127_i32_18 = arith.constant 127 : i32
    %76 = tpu.dynamic_rotate %71 by %c127_i32_18 dim 1 : vector<8x128xf32>, i32 -> vector<8x128xf32>
    %c4_19 = arith.constant 4 : index
    %77 = memref.load %arg1[%c4_19] : memref<9xf32, #tpu.memory_space<smem>>
    %78 = vector.broadcast %77 : f32 to vector<8x128xf32>
    %79 = arith.mulf %76, %78 : vector<8x128xf32>
    %80 = arith.addf %75, %79 : vector<8x128xf32>
    %c126_i32_20 = arith.constant 126 : i32
    %81 = tpu.dynamic_rotate %71 by %c126_i32_20 dim 1 : vector<8x128xf32>, i32 -> vector<8x128xf32>
    %c5_21 = arith.constant 5 : index
    %82 = memref.load %arg1[%c5_21] : memref<9xf32, #tpu.memory_space<smem>>
    %83 = vector.broadcast %82 : f32 to vector<8x128xf32>
    %84 = arith.mulf %81, %83 : vector<8x128xf32>
    %85 = arith.addf %80, %84 : vector<8x128xf32>
    %86 = vector.extract_strided_slice %52 {offsets = [2, 0], sizes = [8, 128], strides = [1, 1]} : vector<16x128xf32> to vector<8x128xf32>
    %c6_22 = arith.constant 6 : index
    %87 = memref.load %arg1[%c6_22] : memref<9xf32, #tpu.memory_space<smem>>
    %88 = vector.broadcast %87 : f32 to vector<8x128xf32>
    %89 = arith.mulf %86, %88 : vector<8x128xf32>
    %90 = arith.addf %85, %89 : vector<8x128xf32>
    %c127_i32_23 = arith.constant 127 : i32
    %91 = tpu.dynamic_rotate %86 by %c127_i32_23 dim 1 : vector<8x128xf32>, i32 -> vector<8x128xf32>
    %c7_24 = arith.constant 7 : index
    %92 = memref.load %arg1[%c7_24] : memref<9xf32, #tpu.memory_space<smem>>
    %93 = vector.broadcast %92 : f32 to vector<8x128xf32>
    %94 = arith.mulf %91, %93 : vector<8x128xf32>
    %95 = arith.addf %90, %94 : vector<8x128xf32>
    %c126_i32_25 = arith.constant 126 : i32
    %96 = tpu.dynamic_rotate %86 by %c126_i32_25 dim 1 : vector<8x128xf32>, i32 -> vector<8x128xf32>
    %c8_26 = arith.constant 8 : index
    %97 = memref.load %arg1[%c8_26] : memref<9xf32, #tpu.memory_space<smem>>
    %98 = vector.broadcast %97 : f32 to vector<8x128xf32>
    %99 = arith.mulf %96, %98 : vector<8x128xf32>
    %100 = arith.addf %95, %99 : vector<8x128xf32>
    %c8_27 = arith.constant 8 : index
    %c0_28 = arith.constant 0 : index
    %101 = vector.load %arg5[%c8_27, %c0_28] : memref<16x128xf32, #tpu.memory_space<vmem>>, vector<8x128xf32>
    tpu.vector_store %arg5[%c8_27, %c0_28], %100 {strides = array<i32>} : memref<16x128xf32, #tpu.memory_space<vmem>>, vector<8x128xf32>,
    return
  }
  func.func @transform_0(%arg0: i32, %arg1: memref<9xf32, #tpu.memory_space<smem>>, %arg2: memref<1xf32, #tpu.memory_space<smem>>) -> (i32, i32) {
    %c0_i32 = arith.constant 0 : i32
    %c0_i32_0 = arith.constant 0 : i32
    return %arg0, %c0_i32 : i32, i32
  }
  func.func @transform_1(%arg0: i32, %arg1: memref<9xf32, #tpu.memory_space<smem>>, %arg2: memref<1xf32, #tpu.memory_space<smem>>) -> (i32, i32) {
    %c1_i32 = arith.constant 1 : i32
    %0 = arith.addi %arg0, %c1_i32 : i32
    %c2_i32 = arith.constant 2 : i32
    %1 = arith.muli %0, %c2_i32 : i32
    %c1_i32_0 = arith.constant 1 : i32
    %2 = arith.minsi %1, %c1_i32_0 : i32
    %c0_i32 = arith.constant 0 : i32
    %c0_i32_1 = arith.constant 0 : i32
    return %2, %c0_i32 : i32, i32
  }
  func.func @transform_2(%arg0: i32, %arg1: memref<9xf32, #tpu.memory_space<smem>>, %arg2: memref<1xf32, #tpu.memory_space<smem>>) -> (i32, i32) {
    %c0_i32 = arith.constant 0 : i32
    %c0_i32_0 = arith.constant 0 : i32
    return %arg0, %c0_i32 : i32, i32
  }
}

</mosaic_0001>

<bundles_post_ra>
// kernel: corr2d_bias_pallas.1
= control target key start
LH: loop header
LB: loop body
LE: loop exit
PB: predicated region body
PF: predicated region fallthrough
CT: control target
= control target key end

     0   :  { %s355_s0 = inlined_call_operand.vmem [shape: f32[9], index: 0, kind: input, shape index: {}]   ;;  %s356_s1 = inlined_call_operand.<no memory space> [shape: f32[1], index: 1, kind: input, shape index: {}]   ;;  %s357_s2 = inlined_call_operand.vmem [shape: f32[16,128], index: 2, kind: input, shape index: {}, may-alias: {2,3}]   ;;  %s358_s3 = inlined_call_operand.vmem [shape: f32[16,128], index: 3, kind: input, shape index: {}, may-alias: {2,3}]   ;;  %s359_s4 = inlined_call_operand.hbm [shape: f32[16,128], index: 4, kind: output, shape index: {}]  }
   0x1   :  { %s9_s17 = sshll.u32 %s355_s0, 4  ;;  %s10_s17 = int_to_ptr.vmem [resolvable:$true] %s9_s17 }
   0x2   :  { %s250_s18 = scalar_lea.vmem %s10_s17, 16  ;;  %p255_p1 = scmp.lt.s32.totalorder %s10_s17, %s10_s17 }
   0x3   :  { %p251_p0 = scmp.ne.s32.totalorder %s10_s17, %s250_s18  ;;  %p256_p2 = scmp.lt.s32.totalorder %s250_s18, %s250_s18 }
   0x5   :  { %p257_p3 = por %p256_p2, %p255_p1 }
   0x7   :  { %p258_p4 = pnand %p257_p3, %p251_p0 }
   0x9   :  { %261 = shalt.err (!%p258_p4)  }
   0xa   :  { %s286_s19 = smov [#allocation3]  }
   0xb   :  { %12 = dma.vmem_to_smem %s10_s17, 16, %s286_s19, [#allocation2] }
   0xc   :  { %282 = dma.done.wait [#allocation2], 16 }
   0xd   :  { %283 = vsyncadd [#allocation2], 4294967280 }
   0xe   :  { %15 = sfence }
   0xf   :  { %v53_v0 = vld [vmem:[%s357_s2] sm:$0xff]  ;;  %v54_v1 = vld [vmem:[%s357_s2 + $0x8] sm:$0xff]  ;;  %s287_s25 = smov 126   ;;  %s288_s26 = smov 127   ;;  %vm79_vm0 = vcmask 1046528  }
  0x10   :  { %v235_v2 = vld [vmem:[%s358_s3 + $0x8] sm:$0xff]  ;;  %67 = vrot.lane.b32.xlu1 %v53_v0, %s287_s25  ;;  %61 = vrot.lane.b32.xlu0 %v53_v0, %s288_s26  ;;  %v88_v3 = vrot.slane %v54_v1, 1  ;;  %v87_v5 = vrot.slane %v53_v0, 1 }
  0x11   :  { %v163_v4 = vrot.slane %v235_v2, 1 }
  0x12   :  { %16 = vsyncpa [#allocation6], 0  ;;  %s238_s27 = sld [smem:[#allocation3 + $0x3]]  ;;  %v89_v7 = vsel %vm79_vm0, %v87_v5, %v88_v3  ;;  %v116_v8 = vrot.slane %v54_v1, 2  ;;  %v189_v9 = vrot.slane %v235_v2, 2  ;;  %vm109_vm1 = vcmask 1045504  }
  0x13   :  { %v164_v6 = vsel %vm79_vm0, %v88_v3, %v163_v4  ;;  %s241_s2 = sld [smem:[#allocation3 + $0x6]]  ;;  %v115_v10 = vrot.slane %v53_v0, 2  ;;  %v59_v33 = vstv %s356_s1  ;;  %s289_s9 = smov [#allocation5]  }
  0x14   :  { %145 = vrot.lane.b32.xlu1 %v54_v1, %s287_s25  ;;  %139 = vrot.lane.b32.xlu0 %v54_v1, %s288_s26  ;;  %v190_v15 = vsel %vm109_vm1, %v116_v8, %v189_v9  ;;  %s55_s3 = sld [smem:[#allocation3]]  ;;  %s210_s10 = sshll.u32 %s289_s9, 4  ;;  %s211_s10 = int_to_ptr.vmem [resolvable:$true] %s210_s10 }
  0x15   :  { %v117_v19 = vsel %vm109_vm1, %v115_v10, %v116_v8  ;;  %s227_s28 = sld [smem:[#allocation3 + $0x1]]  ;;  %s262_s11 = scalar_lea.vmem %s211_s10, 256 }
  0x16   :  { %s228_s29 = sld [smem:[#allocation3 + $0x2]]  ;;  %p263_p5 = scmp.ne.s32.totalorder %s211_s10, %s262_s11 }
  0x17   :  { %s239_s6 = sld [smem:[#allocation3 + $0x4]]  ;;  %p267_p6 = scmp.lt.s32.totalorder %s211_s10, %s211_s10 }
  0x18   :  { %166 = vrot.lane.b32.xlu1 %v164_v6, %s288_s26  ;;  %91 = vrot.lane.b32.xlu0 %v89_v7, %s288_s26  ;;  %v152_v11 = vstv %s238_s27  ;;  %s240_s7 = sld [smem:[#allocation3 + $0x5]]  ;;  %p268_p7 = scmp.lt.s32.totalorder %s262_s11, %s262_s11 }
  0x19   :  { %v153_v12 = vmul.f32 %v152_v11, %v54_v1  ;;  %v154_v13 = vmul.f32 %v235_v2, %v152_v11  ;;  %v75_v14 = vmul.f32 %v152_v11, %v53_v0  ;;  %v179_v18 = vstv %s241_s2  ;;  %s242_s8 = sld [smem:[#allocation3 + $0x7]] }
  0x1a   :  { %v180_v21 = vmul.f32 %v179_v18, %v54_v1  ;;  %v181_v22 = vmul.f32 %v235_v2, %v179_v18  ;;  %v105_v24 = vmul.f32 %v179_v18, %v53_v0  ;;  %v56_v31 = vstv %s55_s3  ;;  %s243_s1 = sld [smem:[#allocation3 + $0x8]]  ;;  %p269_p8 = por %p268_p7, %p267_p6 }
  0x1b   :  { %v157_v16 = vrot.slane %v153_v12, 1  ;;  %v158_v17 = vrot.slane %v154_v13, 1  ;;  %v80_v20 = vrot.slane %v75_v14, 1  ;;  %v57_v32 = vmul.f32 %v56_v31, %v53_v0 }
  0x1c   :  { %172 = vrot.lane.b32.xlu1 %v164_v6, %s287_s25  ;;  %97 = vrot.lane.b32.xlu0 %v89_v7, %s287_s25  ;;  %v184_v26 = vrot.slane %v180_v21, 2  ;;  %v185_v27 = vrot.slane %v181_v22, 2  ;;  %v110_v28 = vrot.slane %v105_v24, 2  ;;  %v64_v34 = vstv %s227_s28  ;;  %p270_p9 = pnand %p269_p8, %p263_p5 }
  0x1d   :  { %v159_v23 = vsel %vm79_vm0, %v157_v16, %v158_v17  ;;  %v82_v25 = vsel %vm79_vm0, %v80_v20, %v157_v16  ;;  %v60_v35 = vadd.f32 %v59_v33, %v57_v32  ;;  %v135_v36 = vmul.f32 %v56_v31, %v54_v1 }
  0x1e   :  { %v186_v29 = vsel %vm109_vm1, %v184_v26, %v185_v27  ;;  %v112_v30 = vsel %vm109_vm1, %v110_v28, %v184_v26  ;;  %v70_v37 = vstv %s228_s29  ;;  %v169_v48 = vstv %s239_s6 }
  0x1f   :  { %v138_v43 = vadd.f32 %v135_v36, %v59_v33  ;;  %v175_v56 = vstv %s240_s7  ;;  %v195_v1 = vstv %s242_s8 }
  0x20   :  { %192 = vrot.lane.b32.xlu1 %v190_v15, %s288_s26  ;;  %119 = vrot.lane.b32.xlu0 %v117_v19, %s288_s26  ;;  %v201_v10 = vstv %s243_s1 }
  0x24   :  { %198 = vrot.lane.b32.xlu1 %v190_v15, %s287_s25  ;;  %125 = vrot.lane.b32.xlu0 %v117_v19, %s287_s25 }
  0x82   :  { %v68_v38 = vpop.permute.xlu1 %67  ;;  %v62_v39 = vpop.permute.xlu0 %61 }
  0x83   :  { %v65_v40 = vmul.f32 %v64_v34, %v62_v39  ;;  %v71_v41 = vmul.f32 %v70_v37, %v68_v38 }
  0x85   :  { %v66_v42 = vadd.f32 %v65_v40, %v60_v35 }
  0x86   :  { %v146_v44 = vpop.permute.xlu1 %145  ;;  %v140_v45 = vpop.permute.xlu0 %139 }
  0x87   :  { %v72_v46 = vadd.f32 %v71_v41, %v66_v42  ;;  %v143_v47 = vmul.f32 %v140_v45, %v64_v34  ;;  %v149_v49 = vmul.f32 %v146_v44, %v70_v37 }
  0x89   :  { %v144_v50 = vadd.f32 %v143_v47, %v138_v43  ;;  %v84_v51 = vadd.f32 %v82_v25, %v72_v46 }
  0x8a   :  { %v167_v52 = vpop.permute.xlu1 %166  ;;  %v92_v53 = vpop.permute.xlu0 %91 }
  0x8b   :  { %v150_v54 = vadd.f32 %v149_v49, %v144_v50  ;;  %v95_v55 = vmul.f32 %v169_v48, %v92_v53  ;;  %v170_v58 = vmul.f32 %v169_v48, %v167_v52 }
  0x8d   :  { %v161_v57 = vadd.f32 %v159_v23, %v150_v54  ;;  %v96_v62 = vadd.f32 %v95_v55, %v84_v51 }
  0x8e   :  { %v173_v59 = vpop.permute.xlu1 %172  ;;  %v98_v60 = vpop.permute.xlu0 %97 }
  0x8f   :  { %v171_v61 = vadd.f32 %v170_v58, %v161_v57  ;;  %v176_v63 = vmul.f32 %v175_v56, %v173_v59  ;;  %v101_v0 = vmul.f32 %v175_v56, %v98_v60 }
  0x91   :  { %v177_v2 = vadd.f32 %v176_v63, %v171_v61  ;;  %v102_v3 = vadd.f32 %v101_v0, %v96_v62 }
  0x92   :  { %v193_v4 = vpop.permute.xlu1 %192  ;;  %v120_v5 = vpop.permute.xlu0 %119 }
  0x93   :  { %v188_v6 = vadd.f32 %v186_v29, %v177_v2  ;;  %v196_v7 = vmul.f32 %v195_v1, %v193_v4  ;;  %v114_v8 = vadd.f32 %v112_v30, %v102_v3  ;;  %v123_v9 = vmul.f32 %v195_v1, %v120_v5 }
  0x95   :  { %v197_v13 = vadd.f32 %v196_v7, %v188_v6  ;;  %v124_v14 = vadd.f32 %v123_v9, %v114_v8 }
  0x96   :  { %v199_v11 = vpop.permute.xlu1 %198  ;;  %v126_v12 = vpop.permute.xlu0 %125 }
  0x97   :  { %v202_v15 = vmul.f32 %v201_v10, %v199_v11  ;;  %v129_v16 = vmul.f32 %v201_v10, %v126_v12 }
  0x99   :  { %v203_v17 = vadd.f32 %v202_v15, %v197_v13  ;;  %v130_v18 = vadd.f32 %v129_v16, %v124_v14 }
  0x9b   :  { %204 = vst [vmem:[#allocation5 + $0x8] sm:$0xff] %v203_v17  ;;  %131 = vst [vmem:[#allocation5] sm:$0xff] %v130_v18 }
  0x9c   :  { %273 = shalt.err (!%p270_p9)
}
  0x9d   :  { %s290_s12 = smov 128   ;;  %s291_s13 = smov 8  }
  0x9e   :  { %216 = dma.vmem_to_hbm [thread:$0]  %s211_s10, 256, %s359_s4, [#allocation6], %s290_s12, %s290_s12, %s291_s13  }
  0x9f   :  { %284 = dma.done.wait [#allocation6], 256  }
  0xa0   :  { %285 = vsyncadd [#allocation6], 4294967040 }
  0xa1   :  { %220 = vsyncpa [#allocation6], 1 }

</bundles_post_ra>
